<compile_context>
chip_gen: v6e
topology: v6e:2x2x1
jax: 0.10.0
libtpu: 0.0.40
codegen_flags: <defaults>
</compile_context>

<pallas_src>
import math
import jax
import jax.numpy as jnp
from jax import lax
from jax.experimental import pallas as pl
from jax.experimental.pallas import tpu as pltpu

H1 = 128
H2 = 128


def critic_kernel(s_ref, w1_ref, b1_ref, w2_ref, b2_ref, w3_ref, b3_ref, o_ref):
    # Layer 1: cast the streamed f32 batch tile to bf16 in-kernel (cheap VPU
    # op hidden under the MXU); f32 accumulate, bias + ReLU in f32.
    x = s_ref[...].astype(jnp.bfloat16)
    h1 = jnp.dot(x, w1_ref[...], preferred_element_type=jnp.float32)
    h1 = jnp.maximum(h1 + b1_ref[...], 0.0)
    # Layer 2: (tile_b, 128)bf16 @ (128, 128)bf16 -> f32.
    h2 = jnp.dot(h1.astype(jnp.bfloat16), w2_ref[...],
                 preferred_element_type=jnp.float32)
    h2 = jnp.maximum(h2 + b2_ref[...], 0.0)
    # Layer 3 (128 -> 1) on the MXU with the batch dim as the matmul N dim:
    # (1, H2) x (tile_b, H2)^T -> (1, tile_b).  Result is lane-dense, so the
    # store below is a full-width vst (no masked single-lane stores, no
    # cross-lane XLU reduction).
    row = lax.dot_general(
        w3_ref[...], h2.astype(jnp.bfloat16),
        dimension_numbers=(((1,), (1,)), ((), ())),
        preferred_element_type=jnp.float32)
    o_ref[...] = (row + b3_ref[0, 0]).astype(o_ref.dtype)


def _round_up(x, m):
    return ((x + m - 1) // m) * m


def prepare_critic_params(params):
    """One-time parameter prep (bf16 MXU weights, w3 as a row, scalar b3).

    Hoisted out of the per-call wrapper so repeated forward calls do not
    re-run HBM cast/reshape passes.
    """
    w1, b1, w2, b2, w3, b3 = params
    return (w1.astype(jnp.bfloat16),
            b1.reshape(1, -1).astype(jnp.float32),
            w2.astype(jnp.bfloat16),
            b2.reshape(1, -1).astype(jnp.float32),
            w3.reshape(1, -1).astype(jnp.bfloat16),
            b3.reshape(1, 1).astype(jnp.float32))


def critic_forward(s, prepared, tile_b=4096):
    """Pallas forward pass. s: (B, Ns) f32; prepared = prepare_critic_params(...)."""
    w1_bf, b1, w2_bf, b2, w3_row, b3 = prepared
    B, Ns = s.shape
    assert w1_bf.shape == (Ns, H1)

    # Batch tile: a multiple of 256, as large as possible (amortize per-step
    # overhead), but never larger than needed to cover B, and -- when B is
    # large enough -- small enough to keep >= 2 grid steps so both v7x
    # TensorCores are used ("parallel" batch axis).
    tile_b = _round_up(max(256, int(tile_b)), 256)
    tile_b = min(tile_b, _round_up(B, 256))
    if B > 512:
        tile_b = min(tile_b, _round_up(pl.cdiv(B, 2), 256))
    grid_b = pl.cdiv(B, tile_b)
    Bp = grid_b * tile_b
    if Bp != B:
        # TODO(synk): rely on Pallas partial-block masking instead of an
        # explicit pad pass when B % tile_b != 0.
        s = jnp.pad(s, ((0, Bp - B), (0, 0)))

    cost = pl.CostEstimate(
        flops=2 * Bp * (Ns * H1 + H1 * H2 + H2),
        transcendentals=0,
        bytes_accessed=(Bp * Ns * 4 + Bp * 4            # s in, values out
                        + 2 * (Ns * H1 + H1 * H2 + H2)  # bf16 weights
                        + 4 * (H1 + H2 + 1)),           # f32 biases
    )

    out = pl.pallas_call(
        critic_kernel,
        out_shape=jax.ShapeDtypeStruct((grid_b, 1, tile_b), jnp.float32),
        grid=(grid_b,),
        in_specs=[
            pl.BlockSpec((tile_b, Ns), lambda i: (i, 0)),        # s tile (f32, streamed)
            pl.BlockSpec((Ns, H1), lambda i: (0, 0)),            # w1 bf16 (resident)
            pl.BlockSpec((1, H1), lambda i: (0, 0)),             # b1 f32  (resident)
            pl.BlockSpec((H1, H2), lambda i: (0, 0)),            # w2 bf16 (resident)
            pl.BlockSpec((1, H2), lambda i: (0, 0)),             # b2 f32  (resident)
            pl.BlockSpec((1, H2), lambda i: (0, 0)),             # w3 row bf16 (resident)
            pl.BlockSpec(memory_space=pltpu.MemorySpace.SMEM),   # b3 scalar
        ],
        out_specs=pl.BlockSpec((None, 1, tile_b), lambda i: (i, 0, 0)),
        compiler_params=pltpu.CompilerParams(
            dimension_semantics=("parallel",)),
        cost_estimate=cost,
    )(s, w1_bf, b1, w2_bf, b2, w3_row, b3)

    # (grid_b, 1, tile_b) -> (B, 1): contiguous reshape + slice (cheap).
    return out.reshape(Bp)[:B].reshape(B, 1)


def init_critic_params(key, Ns):
    """Deterministic init mimicking PyTorch nn.Linear default
    (U[-1/sqrt(fan_in), 1/sqrt(fan_in)])."""
    def linear(key, fan_in, fan_out):
        kw, kb = jax.random.split(key)
        bound = 1.0 / math.sqrt(fan_in)
        w = jax.random.uniform(kw, (fan_in, fan_out), jnp.float32, -bound, bound)
        b = jax.random.uniform(kb, (fan_out,), jnp.float32, -bound, bound)
        return w, b

    k1, k2, k3 = jax.random.split(key, 3)
    w1, b1 = linear(k1, Ns, H1)
    w2, b2 = linear(k2, H1, H2)
    w3, b3 = linear(k3, H2, 1)
    return (w1, b1, w2, b2, w3, b3)


def critic_reference_f32(s, params):
    """Pure f32 reference (PyTorch-equivalent semantics)."""
    w1, b1, w2, b2, w3, b3 = params
    x = jnp.maximum(s @ w1 + b1, 0.0)
    x = jnp.maximum(x @ w2 + b2, 0.0)
    return x @ w3 + b3


def critic_reference_matched(s, params):
    """Reference with the same bf16-operand / f32-accumulate precision as the kernel."""
    w1, b1, w2, b2, w3, b3 = params
    h1 = jnp.dot(s.astype(jnp.bfloat16), w1.astype(jnp.bfloat16),
                 preferred_element_type=jnp.float32)
    h1 = jnp.maximum(h1 + b1, 0.0)
    h2 = jnp.dot(h1.astype(jnp.bfloat16), w2.astype(jnp.bfloat16),
                 preferred_element_type=jnp.float32)
    h2 = jnp.maximum(h2 + b2, 0.0)
    v = jnp.dot(h2.astype(jnp.bfloat16), w3.astype(jnp.bfloat16),
                preferred_element_type=jnp.float32)
    return v + b3


if __name__ == "__main__":
    key = jax.random.PRNGKey(0)
    k_s, k_p = jax.random.split(key)

    # Small shapes; B chosen so the clamp logic yields a multi-step grid
    # (tile_b=256 -> 3 grid steps) plus a padded final tile.
    B, Ns = 600, 8
    s = jax.random.normal(k_s, (B, Ns), dtype=jnp.float32)
    params = init_critic_params(k_p, Ns)
    prepared = prepare_critic_params(params)

    out = critic_forward(s, prepared, tile_b=256)
    out = jax.block_until_ready(out)
    assert out.shape == (B, 1)

    # Precision-matched check (tight).
    ref_matched = critic_reference_matched(s, params)
    assert jnp.allclose(out, ref_matched, atol=2e-4, rtol=2e-4), \
        "Pallas output mismatch vs precision-matched reference"

    # Semantics sanity check vs pure-f32 PyTorch-equivalent reference
    # (looser tolerance due to bf16 matmul operands).
    ref_f32 = critic_reference_f32(s, params)
    assert jnp.allclose(out, ref_f32, atol=1e-1, rtol=1e-1), \
        "Pallas output mismatch vs f32 reference"

    print("KERNEL_OK")
</pallas_src>

<mosaic_0001>
module attributes {stable_mosaic.version = 11 : i64} {
  func.func @critic_kernel(%arg0: i32, %arg1: memref<256x8xf32, #tpu.memory_space<vmem>>, %arg2: memref<8x128xbf16, #tpu.memory_space<vmem>>, %arg3: memref<1x128xf32, #tpu.memory_space<vmem>>, %arg4: memref<128x128xbf16, #tpu.memory_space<vmem>>, %arg5: memref<1x128xf32, #tpu.memory_space<vmem>>, %arg6: memref<1x128xbf16, #tpu.memory_space<vmem>>, %arg7: memref<1x1xf32, #tpu.memory_space<smem>>, %arg8: memref<1x1x256xf32, #tpu.memory_space<vmem>>) attributes {dimension_semantics = [#tpu.dimension_semantics<parallel>], iteration_bounds = array<i64: 3>, scalar_prefetch = 0 : i64, scratch_operands = 0 : i64, tpu.core_type = #tpu.core_type<tc>, window_params = [{transform_indices = @transform_0, window_bounds = array<i64: 256, 8>}, {pipeline_mode = #tpu.pipeline_mode<synchronous>, transform_indices = @transform_1, window_bounds = array<i64: 8, 128>}, {pipeline_mode = #tpu.pipeline_mode<synchronous>, transform_indices = @transform_2, window_bounds = array<i64: 1, 128>}, {pipeline_mode = #tpu.pipeline_mode<synchronous>, transform_indices = @transform_3, window_bounds = array<i64: 128, 128>}, {pipeline_mode = #tpu.pipeline_mode<synchronous>, transform_indices = @transform_4, window_bounds = array<i64: 1, 128>}, {pipeline_mode = #tpu.pipeline_mode<synchronous>, transform_indices = @transform_5, window_bounds = array<i64: 1, 128>}, {transform_indices = @transform_6, window_bounds = array<i64: 1, 1>}, {transform_indices = @transform_7, window_bounds = array<i64: 1, 1, 256>}]} {
    %c0 = arith.constant 0 : index
    %c0_0 = arith.constant 0 : index
    %0 = vector.load %arg1[%c0, %c0_0] : memref<256x8xf32, #tpu.memory_space<vmem>>, vector<256x8xf32>
    %1 = arith.truncf %0 : vector<256x8xf32> to vector<256x8xbf16>
    %c0_1 = arith.constant 0 : index
    %c0_2 = arith.constant 0 : index
    %2 = vector.load %arg2[%c0_1, %c0_2] : memref<8x128xbf16, #tpu.memory_space<vmem>>, vector<8x128xbf16>
    %cst = arith.constant dense<0.000000e+00> : vector<256x128xf32>
    %3 = tpu.matmul %1, %2, %cst {dimension_numbers = #tpu.dot_dimension_numbers<[1], [0], [0], [1], [0, 0, 1, 1], [], []>} : vector<256x8xbf16>, vector<8x128xbf16>, vector<256x128xf32> -> vector<256x128xf32>
    %c0_3 = arith.constant 0 : index
    %c0_4 = arith.constant 0 : index
    %4 = vector.load %arg3[%c0_3, %c0_4] : memref<1x128xf32, #tpu.memory_space<vmem>>, vector<1x128xf32>
    %5 = vector.broadcast %4 : vector<1x128xf32> to vector<256x128xf32>
    %6 = arith.addf %3, %5 : vector<256x128xf32>
    %cst_5 = arith.constant 0.000000e+00 : f32
    %7 = vector.broadcast %cst_5 : f32 to vector<256x128xf32>
    %8 = arith.maximumf %6, %7 : vector<256x128xf32>
    %9 = arith.truncf %8 : vector<256x128xf32> to vector<256x128xbf16>
    %c0_6 = arith.constant 0 : index
    %c0_7 = arith.constant 0 : index
    %10 = vector.load %arg4[%c0_6, %c0_7] : memref<128x128xbf16, #tpu.memory_space<vmem>>, vector<128x128xbf16>
    %cst_8 = arith.constant dense<0.000000e+00> : vector<256x128xf32>
    %11 = tpu.matmul %9, %10, %cst_8 {dimension_numbers = #tpu.dot_dimension_numbers<[1], [0], [0], [1], [0, 0, 1, 1], [], []>} : vector<256x128xbf16>, vector<128x128xbf16>, vector<256x128xf32> -> vector<256x128xf32>
    %c0_9 = arith.constant 0 : index
    %c0_10 = arith.constant 0 : index
    %12 = vector.load %arg5[%c0_9, %c0_10] : memref<1x128xf32, #tpu.memory_space<vmem>>, vector<1x128xf32>
    %13 = vector.broadcast %12 : vector<1x128xf32> to vector<256x128xf32>
    %14 = arith.addf %11, %13 : vector<256x128xf32>
    %cst_11 = arith.constant 0.000000e+00 : f32
    %15 = vector.broadcast %cst_11 : f32 to vector<256x128xf32>
    %16 = arith.maximumf %14, %15 : vector<256x128xf32>
    %c0_12 = arith.constant 0 : index
    %c0_13 = arith.constant 0 : index
    %17 = vector.load %arg6[%c0_12, %c0_13] : memref<1x128xbf16, #tpu.memory_space<vmem>>, vector<1x128xbf16>
    %18 = arith.truncf %16 : vector<256x128xf32> to vector<256x128xbf16>
    %cst_14 = arith.constant dense<0.000000e+00> : vector<1x256xf32>
    %19 = tpu.matmul %17, %18, %cst_14 {dimension_numbers = #tpu.dot_dimension_numbers<[1], [1], [0], [0], [0, 0, 1, 0], [], []>} : vector<1x128xbf16>, vector<256x128xbf16>, vector<1x256xf32> -> vector<1x256xf32>
    %c0_15 = arith.constant 0 : index
    %c0_16 = arith.constant 0 : index
    %20 = memref.load %arg7[%c0_15, %c0_16] : memref<1x1xf32, #tpu.memory_space<smem>>
    %21 = vector.broadcast %20 : f32 to vector<1x256xf32>
    %22 = arith.addf %19, %21 : vector<1x256xf32>
    %c0_17 = arith.constant 0 : index
    %c0_18 = arith.constant 0 : index
    %c0_19 = arith.constant 0 : index
    %23 = vector.load %arg8[%c0_17, %c0_18, %c0_19] : memref<1x1x256xf32, #tpu.memory_space<vmem>>, vector<1x1x256xf32>
    %24 = vector.shape_cast %23 : vector<1x1x256xf32> to vector<1x256xf32>
    %25 = vector.shape_cast %22 : vector<1x256xf32> to vector<1x1x256xf32>
    tpu.vector_store %arg8[%c0_17, %c0_18, %c0_19], %25 {strides = array<i32>} : memref<1x1x256xf32, #tpu.memory_space<vmem>>, vector<1x1x256xf32>,
    return
  }
  func.func @transform_0(%arg0: i32) -> (i32, i32) {
    %c0_i32 = arith.constant 0 : i32
    %c0_i32_0 = arith.constant 0 : i32
    return %arg0, %c0_i32 : i32, i32
  }
  func.func @transform_1(%arg0: i32) -> (i32, i32) {
    %c0_i32 = arith.constant 0 : i32
    %c0_i32_0 = arith.constant 0 : i32
    %c0_i32_1 = arith.constant 0 : i32
    return %c0_i32, %c0_i32_0 : i32, i32
  }
  func.func @transform_2(%arg0: i32) -> (i32, i32) {
    %c0_i32 = arith.constant 0 : i32
    %c0_i32_0 = arith.constant 0 : i32
    %c0_i32_1 = arith.constant 0 : i32
    return %c0_i32, %c0_i32_0 : i32, i32
  }
  func.func @transform_3(%arg0: i32) -> (i32, i32) {
    %c0_i32 = arith.constant 0 : i32
    %c0_i32_0 = arith.constant 0 : i32
    %c0_i32_1 = arith.constant 0 : i32
    return %c0_i32, %c0_i32_0 : i32, i32
  }
  func.func @transform_4(%arg0: i32) -> (i32, i32) {
    %c0_i32 = arith.constant 0 : i32
    %c0_i32_0 = arith.constant 0 : i32
    %c0_i32_1 = arith.constant 0 : i32
    return %c0_i32, %c0_i32_0 : i32, i32
  }
  func.func @transform_5(%arg0: i32) -> (i32, i32) {
    %c0_i32 = arith.constant 0 : i32
    %c0_i32_0 = arith.constant 0 : i32
    %c0_i32_1 = arith.constant 0 : i32
    return %c0_i32, %c0_i32_0 : i32, i32
  }
  func.func @transform_6(%arg0: i32) -> (i32, i32) {
    %c0_i32 = arith.constant 0 : i32
    %c0_i32_0 = arith.constant 0 : i32
    %c0_i32_1 = arith.constant 0 : i32
    return %c0_i32, %c0_i32_0 : i32, i32
  }
  func.func @transform_7(%arg0: i32) -> (i32, i32, i32) {
    %c0_i32 = arith.constant 0 : i32
    %c0_i32_0 = arith.constant 0 : i32
    %c0_i32_1 = arith.constant 0 : i32
    return %arg0, %c0_i32, %c0_i32_0 : i32, i32, i32
  }
}

</mosaic_0001>

<bundles_post_ra>
// kernel: tpu_custom_call.1
= control target key start
LH: loop header
LB: loop body
LE: loop exit
PB: predicated region body
PF: predicated region fallthrough
CT: control target
= control target key end

     0   :  { %s1630_s0 = inlined_call_operand.vmem [shape: f32[768,8], index: 0, kind: input, shape index: {}]   ;;  %s1631_s1 = inlined_call_operand.vmem [shape: bf16[8,128], index: 1, kind: input, shape index: {}]   ;;  %s1632_s2 = inlined_call_operand.vmem [shape: f32[1,128], index: 2, kind: input, shape index: {}]   ;;  %s1633_s3 = inlined_call_operand.vmem [shape: bf16[128,128], index: 3, kind: input, shape index: {}]   ;;  %s1634_s4 = inlined_call_operand.vmem [shape: f32[1,128], index: 4, kind: input, shape index: {}]   ;;  %s1635_s5 = inlined_call_operand.vmem [shape: bf16[1,128], index: 5, kind: input, shape index: {}]   ;;  %s1636_s6 = inlined_call_operand.<no memory space> [shape: f32[1,1], index: 6, kind: input, shape index: {}]   ;;  %s1637_s7 = inlined_call_operand.hbm [shape: f32[3,1,256], index: 7, kind: output, shape index: {}]  }
   0x1   :  { %12 = sst [smem:[#allocation2]] %s1636_s6 }
   0x2   :  { %13 = vsyncpa [#allocation4], 0 }
   0x3   :  { %15 = vsyncpa [#allocation4 + $0x1], 0  ;;  %s1356_s26 = smov 0   ;;  %s1358_s27 = smov 0  }
   0x4   :  { %s1360_s28 = smov 0   ;;  %s1362_s29 = smov 0  }
   0x5 LB: > { %s1019_s6 = sadd.s32 4294967295, %s1309_s29   ;;  %s1020_s30 = sadd.s32 4294967294, %s1309_s29   ;;  %s1309_s29 = sphi %s1362_s29, %s1643_s29   ;;  %s1305_s28 = sphi %s1360_s28, %s1642_s28   ;;  %s1301_s27 = sphi %s1358_s27, %s1641_s27   ;;  %s1297_s26 = sphi %s1356_s26, %s1640_s26  }
   0x6   : > { %s1379_s8 = sadd.s32 1, %s1309_s29   ;;  %s180_s9 = sadd.s32 1, %s1305_s28 }
   0x7   : > { %s177_s10 = ssub.s32 %s1309_s29, %s1379_s8  ;;  %p190_p0 = scmp.ne.s32.totalorder %s1305_s28, %s1301_s27 }
   0x8   : > { %p178_p1 = scmp.eq.s32.totalorder %s177_s10, 0  ;;  %p191_p2 = scmp.eq.s32.totalorder %s1019_s6, 2 }
   0x9   : > { %p196_p3 = scmp.ne.s32.totalorder %s1301_s27, %s1297_s26  ;;  %p197_p4 = scmp.eq.s32.totalorder %s1020_s30, 2 }
   0xa   : > { %s1389_s11 = scalar_select %p178_p1, %s1305_s28, %s180_s9  }
   0xb   : > { %p1391_p5 = por %p191_p2, %p190_p0  ;;  %p1395_p6 = por %p197_p4, %p196_p3 }
   0xc   : > { %p1023_p7 = scmp.ge.s32.totalorder %s1309_s29, 1  ;;  %p242_p8 = scmp.lt.s32.totalorder %s1309_s29, 4 }
   0xe   : > { %p243_p9 = pnand %p1023_p7, %p242_p8 }
   0xf   : > { %s1404_s16 = sshll.u32 (!%p243_p9), %s1019_s6, 5  ;;  %s880_s10 = sld [smem:[#allocation2]] (!%p243_p9) }
  0x10   : > { %246 = sbr.rel (%p243_p9) target bundleno = 774 (0x306), region = 48  ;;  %p275_p10 = scmp.lt.s32.totalorder (!%p243_p9), %s1404_s16, 95 }
  0x11   : > { %s271_s14 = sand.u32 (!%p243_p9), 1, %s1301_s27  }
  0x12   : > { %s1024_s15 = sshll.u32 (!%p243_p9), %s271_s14, 1  ;;  %s947_s22 = scalar_lea.sflag (!%p243_p9), [#allocation4], %s271_s14 }
  0x13   : > { %s273_s17 = scalar_lea.vmem (!%p243_p9), [#allocation3], %s1024_s15 }
  0x14   : > { %s961_s18 = sshll.u32 (!%p243_p9), %s273_s17, 4  ;;  %s962_s18 = int_to_ptr.vmem [resolvable:$true] %s961_s18 }
  0x15   : > { %v329_v0 = vld [vmem:[%s1631_s1] sm:$0xf]  ;;  %vm386_vm0 = vcmask 1043456   ;;  %v1241_v1 = vld [vmem:[%s1633_s3 + $0x38] sm:$0xff]   ;;  %v1242_v3 = vld [vmem:[%s1633_s3 + $0x30] sm:$0xff]   ;;  %s276_s21 = scalar_select %p275_p10, %s1404_s16, 95 }
  0x16   : > { %1200 = vmatprep.subr.msk.bf16.mxu0 %vm386_vm0, %v329_v0  ;;  %v388_v2 = vsel %vm386_vm0, %v329_v0, 0  ;;  %1152 = vmatprep.subr.bf16.mxu1 %v1241_v1  ;;  %v1243_v4 = vld [vmem:[%s1633_s3 + $0x28] sm:$0xff]   ;;  %v1244_v5 = vld [vmem:[%s1633_s3 + $0x20] sm:$0xff]   ;;  %vm337_vm1 = vcmask 64512   ;;  %v1245_v17 = vld [vmem:[%s1633_s3 + $0x18] sm:$0xff]   ;;  %s1249_s23 = scalar_lea.vmem %s962_s18, 32 }
  0x17   : > { %1119 = vmatpush3.bf16.msra.mxu0 %v388_v2  ;;  %1153 = vmatpush3.bf16.msra.mxu1 %v1241_v1  ;;  %s1026_s24 = sshll.u32 %s276_s21, 3  ;;  %v1246_v55 = vld [vmem:[%s1633_s3 + $0x10] sm:$0xff]   ;;  %v1247_v56 = vld [vmem:[%s1633_s3 + $0x8] sm:$0xff]   ;;  %v1248_v57 = vld [vmem:[%s1633_s3] sm:$0xff]   ;;  %s959_s21 = scalar_lea.hbm %s1637_s7, %s1404_s16 }
  0x18   : > { %1154 = vmatprep.subr.bf16.mxu1 %v1242_v3  ;;  %s1420_s30 = scalar_lea.vmem %s1630_s0, %s1026_s24  ;;  %v1488_v60 = vld [vmem:[%s1632_s2] ss:$0 sm:$0xff]  ;;  %p1250_p11 = scmp.ne.s32.totalorder %s962_s18, %s1249_s23 }
  0x19   : > { %v281_v6 = vld [vmem:[%s1420_s30] sm:$0xff]  ;;  %v282_v7 = vld [vmem:[%s1420_s30 + $0x8] sm:$0xff]  ;;  %v283_v8 = vld [vmem:[%s1420_s30 + $0x10] sm:$0xff]  ;;  %s1312_s24 = smov [#allocation3]  }
  0x1a   : > { %v313_v9 = vpack.c.bf16 %v282_v7, %v281_v6  ;;  %v284_v10 = vld [vmem:[%s1420_s30 + $0x18] sm:$0xff]  ;;  %v285_v11 = vld [vmem:[%s1420_s30 + $0x20] sm:$0xff]  ;;  %v286_v12 = vld [vmem:[%s1420_s30 + $0x28] sm:$0xff]  ;;  %p1251_p12 = pnand %p1250_p11, %p1391_p5  ;;  %s1253_s25 = sshll.u32 %s1312_s24, 4  ;;  %s1254_s25 = int_to_ptr.vmem [resolvable:$false] %s1253_s25 }
  0x1b   : > { %1155 = vmatpush3.bf16.msra.mxu1 %v1242_v3  ;;  %v314_v13 = vpack.c.bf16 %v284_v10, %v283_v8  ;;  %v315_v14 = vpack.c.bf16 %v286_v12, %v285_v11  ;;  %v287_v15 = vld [vmem:[%s1420_s30 + $0x30] sm:$0xff]  ;;  %v288_v16 = vld [vmem:[%s1420_s30 + $0x38] sm:$0xff]  ;;  %v289_v18 = vld [vmem:[%s1420_s30 + $0x40] sm:$0xff]  ;;  %s1255_s6 = scalar_lea.vmem %s1254_s25, 64  ;;  %p1256_p0 = scmp.lt.s32.totalorder %s962_s18, %s1254_s25 }
  0x1c   : > { %1156 = vmatprep.subr.bf16.mxu1 %v1243_v4  ;;  %1120 = vmatprep.mubr.msk.bf16.mxu0 %vm337_vm1, %v313_v9  ;;  %v290_v19 = vld [vmem:[%s1420_s30 + $0x48] sm:$0xff]  ;;  %v316_v20 = vpack.c.bf16 %v288_v16, %v287_v15  ;;  %v291_v22 = vld [vmem:[%s1420_s30 + $0x50] sm:$0xff]  ;;  %v292_v23 = vld [vmem:[%s1420_s30 + $0x58] sm:$0xff]  ;;  %p1252_p13 = pneg %p1251_p12  ;;  %p1257_p1 = scmp.lt.s32.totalorder %s1255_s6, %s1249_s23 }
  0x1d   : > { %1121 = vmatmul.mubr.msk.bf16.vlgmr.msra.gmra.mxu0 %vm337_vm1, %v314_v13  ;;  %v317_v21 = vpack.c.bf16 %v290_v19, %v289_v18  ;;  %v293_v24 = vld [vmem:[%s1420_s30 + $0x60] sm:$0xff]  ;;  %v294_v25 = vld [vmem:[%s1420_s30 + $0x68] sm:$0xff]  ;;  %v318_v26 = vpack.c.bf16 %v292_v23, %v291_v22  ;;  %v295_v28 = vld [vmem:[%s1420_s30 + $0x70] sm:$0xff] }
  0x1e   : > { %1124 = vmatprep.mubr.msk.bf16.mxu0 %vm337_vm1, %v315_v14  ;;  %v319_v27 = vpack.c.bf16 %v294_v25, %v293_v24  ;;  %v296_v29 = vld [vmem:[%s1420_s30 + $0x78] sm:$0xff]  ;;  %v297_v30 = vld [vmem:[%s1420_s30 + $0x80] sm:$0xff]  ;;  %v298_v31 = vld [vmem:[%s1420_s30 + $0x88] sm:$0xff]  ;;  %p1258_p2 = por %p1257_p1, %p1256_p0 }
  0x1f   : > { %1157 = vmatpush3.bf16.msra.mxu1 %v1243_v4  ;;  %v320_v32 = vpack.c.bf16 %v296_v29, %v295_v28  ;;  %v321_v33 = vpack.c.bf16 %v298_v31, %v297_v30  ;;  %v299_v34 = vld [vmem:[%s1420_s30 + $0x90] sm:$0xff]  ;;  %v300_v35 = vld [vmem:[%s1420_s30 + $0x98] sm:$0xff]  ;;  %v301_v36 = vld [vmem:[%s1420_s30 + $0xa0] sm:$0xff] }
  0x20   : > { %1158 = vmatprep.subr.bf16.mxu1 %v1244_v5  ;;  %v302_v37 = vld [vmem:[%s1420_s30 + $0xa8] sm:$0xff]  ;;  %v322_v38 = vpack.c.bf16 %v300_v35, %v299_v34  ;;  %v303_v40 = vld [vmem:[%s1420_s30 + $0xb0] sm:$0xff]  ;;  %v304_v41 = vld [vmem:[%s1420_s30 + $0xb8] sm:$0xff]  ;;  %p1259_p3 = pnand %p1258_p2, %p1252_p13 }
  0x21   : > { %v323_v39 = vpack.c.bf16 %v302_v37, %v301_v36  ;;  %v305_v42 = vld [vmem:[%s1420_s30 + $0xc0] sm:$0xff]  ;;  %v306_v43 = vld [vmem:[%s1420_s30 + $0xc8] sm:$0xff]  ;;  %v324_v44 = vpack.c.bf16 %v304_v41, %v303_v40  ;;  %v307_v46 = vld [vmem:[%s1420_s30 + $0xd0] sm:$0xff] }
  0x22   : > { %v325_v45 = vpack.c.bf16 %v306_v43, %v305_v42  ;;  %v308_v47 = vld [vmem:[%s1420_s30 + $0xd8] sm:$0xff]  ;;  %v309_v48 = vld [vmem:[%s1420_s30 + $0xe0] sm:$0xff]  ;;  %v310_v49 = vld [vmem:[%s1420_s30 + $0xe8] sm:$0xff] }
  0x23   : > { %1159 = vmatpush3.bf16.msra.mxu1 %v1244_v5  ;;  %v326_v50 = vpack.c.bf16 %v308_v47, %v307_v46  ;;  %v327_v51 = vpack.c.bf16 %v310_v49, %v309_v48  ;;  %v311_v52 = vld [vmem:[%s1420_s30 + $0xf0] sm:$0xff]  ;;  %v312_v53 = vld [vmem:[%s1420_s30 + $0xf8] sm:$0xff] }
  0x24   : > { %1160 = vmatprep.subr.bf16.mxu1 %v1245_v17  ;;  %v328_v54 = vpack.c.bf16 %v312_v53, %v311_v52 }
  0x25   : > { %1125 = vmatmul.mubr.msk.bf16.gmra.mxu0 %vm337_vm1, %v316_v20 }
  0x26   : > { %1128 = vmatprep.mubr.msk.bf16.mxu0 %vm337_vm1, %v317_v21 }
  0x27   : > { %1161 = vmatpush3.bf16.msra.mxu1 %v1245_v17 }
  0x28   : > { %1162 = vmatprep.subr.bf16.mxu1 %v1246_v55 }
  0x2b   : > { %1163 = vmatpush3.bf16.msra.mxu1 %v1246_v55 }
  0x2c   : > { %1164 = vmatprep.subr.bf16.mxu1 %v1247_v56 }
  0x2d   : > { %1129 = vmatmul.mubr.msk.bf16.gmra.mxu0 %vm337_vm1, %v318_v26 }
  0x2e   : > { %1132 = vmatprep.mubr.msk.bf16.mxu0 %vm337_vm1, %v319_v27 }
  0x2f   : > { %1165 = vmatpush3.bf16.msra.mxu1 %v1247_v56 }
  0x30   : > { %1166 = vmatprep.subr.bf16.mxu1 %v1248_v57 }
  0x33   : > { %1167 = vmatpush3.bf16.msra.mxu1 %v1248_v57 }
  0x35   : > { %1133 = vmatmul.mubr.msk.bf16.gmra.mxu0 %vm337_vm1, %v320_v32 }
  0x36   : > { %1136 = vmatprep.mubr.msk.bf16.mxu0 %vm337_vm1, %v321_v33 }
  0x3d   : > { %1137 = vmatmul.mubr.msk.bf16.gmra.mxu0 %vm337_vm1, %v322_v38 }
  0x3e   : > { %1140 = vmatprep.mubr.msk.bf16.mxu0 %vm337_vm1, %v323_v39 }
  0x45   : > { %1141 = vmatmul.mubr.msk.bf16.gmra.mxu0 %vm337_vm1, %v324_v44 }
  0x46   : > { %1144 = vmatprep.mubr.msk.bf16.mxu0 %vm337_vm1, %v325_v45 }
  0x4d   : > { %1145 = vmatmul.mubr.msk.bf16.gmra.mxu0 %vm337_vm1, %v326_v50 }
  0x4e   : > { %1148 = vmatprep.mubr.msk.bf16.mxu0 %vm337_vm1, %v327_v51 }
  0x55   : > { %1149 = vmatmul.mubr.msk.bf16.gmra.mxu0 %vm337_vm1, %v328_v54 }
  0xdd   : > { %v1122_v58 = vpop.f32.mrf.mxu0 }
  0xde   : > { %v433_v0 = vadd.f32 %v1122_v58, %v1488_v60 }
  0xdf   : > { %v424_v59 = vpop.f32.mrf.mxu0 }
  0xe0   : > { %v425_v62 = vadd.f32 %v1488_v60, %v424_v59  ;;  %v553_v7 = vmax.f32 %v433_v0, 0.0 }
  0xe1   : > { %v1123_v61 = vpop.f32.mrf.mxu0 }
  0xe2   : > { %v436_v63 = vadd.f32 %v1123_v61, %v1488_v60  ;;  %v551_v5 = vmax.f32 %v425_v62, 0.0 }
  0xe3   : > { %v427_v1 = vpop.f32.mrf.mxu0 }
  0xe4   : > { %v428_v2 = vadd.f32 %v1488_v60, %v427_v1  ;;  %v554_v3 = vmax.f32 %v436_v63, 0.0 }
  0xe5   : > { %v1126_v4 = vpop.f32.mrf.mxu0 }
  0xe6   : > { %v552_v6 = vmax.f32 %v428_v2, 0.0  ;;  %v584_v10 = vpack.c.bf16 %v554_v3, %v553_v7  ;;  %v449_v14 = vadd.f32 %v1126_v4, %v1488_v60 }
  0xe7   : > { %v440_v8 = vpop.f32.mrf.mxu0 }
  0xe8   : > { %v583_v9 = vpack.c.bf16 %v552_v6, %v551_v5  ;;  %v441_v12 = vadd.f32 %v1488_v60, %v440_v8  ;;  %v557_v21 = vmax.f32 %v449_v14, 0.0 }
  0xe9   : > { %v1127_v11 = vpop.f32.mrf.mxu0 }
  0xea   : > { %v452_v13 = vadd.f32 %v1127_v11, %v1488_v60  ;;  %1168 = vmatprep.mubr.bf16.mxu1 %v583_v9  ;;  %v555_v19 = vmax.f32 %v441_v12, 0.0 }
  0xeb   : > { %v443_v15 = vpop.f32.mrf.mxu0  ;;  %1169 = vmatmul.mubr.bf16.vlgmr.msra.gmra.mxu1 %v584_v10 }
  0xec   : > { %v444_v16 = vadd.f32 %v1488_v60, %v443_v15  ;;  %v558_v17 = vmax.f32 %v452_v13, 0.0 }
  0xed   : > { %v1130_v18 = vpop.f32.mrf.mxu0 }
  0xee   : > { %v556_v20 = vmax.f32 %v444_v16, 0.0  ;;  %v586_v24 = vpack.c.bf16 %v558_v17, %v557_v21  ;;  %v465_v28 = vadd.f32 %v1130_v18, %v1488_v60 }
  0xef   : > { %v456_v22 = vpop.f32.mrf.mxu0 }
  0xf0   : > { %v585_v23 = vpack.c.bf16 %v556_v20, %v555_v19  ;;  %v457_v26 = vadd.f32 %v1488_v60, %v456_v22  ;;  %v561_v35 = vmax.f32 %v465_v28, 0.0 }
  0xf1   : > { %v1131_v25 = vpop.f32.mrf.mxu0 }
  0xf2   : > { %v468_v27 = vadd.f32 %v1131_v25, %v1488_v60  ;;  %1172 = vmatprep.mubr.bf16.mxu1 %v585_v23  ;;  %v559_v33 = vmax.f32 %v457_v26, 0.0 }
  0xf3   : > { %v459_v29 = vpop.f32.mrf.mxu0  ;;  %1173 = vmatmul.mubr.bf16.gmra.mxu1 %v586_v24 }
  0xf4   : > { %v460_v30 = vadd.f32 %v1488_v60, %v459_v29  ;;  %v562_v31 = vmax.f32 %v468_v27, 0.0 }
  0xf5   : > { %v1134_v32 = vpop.f32.mrf.mxu0 }
  0xf6   : > { %v560_v34 = vmax.f32 %v460_v30, 0.0  ;;  %v588_v38 = vpack.c.bf16 %v562_v31, %v561_v35  ;;  %v481_v42 = vadd.f32 %v1134_v32, %v1488_v60 }
  0xf7   : > { %v472_v36 = vpop.f32.mrf.mxu0 }
  0xf8   : > { %v587_v37 = vpack.c.bf16 %v560_v34, %v559_v33  ;;  %v473_v40 = vadd.f32 %v1488_v60, %v472_v36  ;;  %v565_v49 = vmax.f32 %v481_v42, 0.0 }
  0xf9   : > { %v1135_v39 = vpop.f32.mrf.mxu0 }
  0xfa   : > { %v484_v41 = vadd.f32 %v1135_v39, %v1488_v60  ;;  %1176 = vmatprep.mubr.bf16.mxu1 %v587_v37  ;;  %v563_v47 = vmax.f32 %v473_v40, 0.0 }
  0xfb   : > { %v475_v43 = vpop.f32.mrf.mxu0  ;;  %1177 = vmatmul.mubr.bf16.gmra.mxu1 %v588_v38 }
  0xfc   : > { %v476_v44 = vadd.f32 %v1488_v60, %v475_v43  ;;  %v566_v45 = vmax.f32 %v484_v41, 0.0 }
  0xfd   : > { %v1138_v46 = vpop.f32.mrf.mxu0 }
  0xfe   : > { %v564_v48 = vmax.f32 %v476_v44, 0.0  ;;  %v590_v52 = vpack.c.bf16 %v566_v45, %v565_v49  ;;  %v497_v56 = vadd.f32 %v1138_v46, %v1488_v60  ;;  %v1525_v44 = vld [vmem:[%s1635_s5] sm:$0x1] }
  0xff   : > { %v488_v50 = vpop.f32.mrf.mxu0  ;;  %1116 = vmatprep.mubr.bf16.mxu0 %v1525_v44 }
 0x100   : > { %v589_v51 = vpack.c.bf16 %v564_v48, %v563_v47  ;;  %v489_v54 = vadd.f32 %v1488_v60, %v488_v50  ;;  %v569_v0 = vmax.f32 %v497_v56, 0.0 }
 0x101   : > { %v1139_v53 = vpop.f32.mrf.mxu0 }
 0x102   : > { %v500_v55 = vadd.f32 %v1139_v53, %v1488_v60  ;;  %1180 = vmatprep.mubr.bf16.mxu1 %v589_v51  ;;  %v567_v62 = vmax.f32 %v489_v54, 0.0 }
 0x103   : > { %v491_v57 = vpop.f32.mrf.mxu0  ;;  %1181 = vmatmul.mubr.bf16.gmra.mxu1 %v590_v52 }
 0x104   : > { %v492_v58 = vadd.f32 %v1488_v60, %v491_v57  ;;  %v570_v59 = vmax.f32 %v500_v55, 0.0 }
 0x105   : > { %v1142_v61 = vpop.f32.mrf.mxu0 }
 0x106   : > { %v568_v63 = vmax.f32 %v492_v58, 0.0  ;;  %v592_v3 = vpack.c.bf16 %v570_v59, %v569_v0  ;;  %v513_v7 = vadd.f32 %v1142_v61, %v1488_v60 }
 0x107   : > { %v504_v1 = vpop.f32.mrf.mxu0 }
 0x108   : > { %v591_v2 = vpack.c.bf16 %v568_v63, %v567_v62  ;;  %v505_v5 = vadd.f32 %v1488_v60, %v504_v1  ;;  %v573_v14 = vmax.f32 %v513_v7, 0.0 }
 0x109   : > { %v1143_v4 = vpop.f32.mrf.mxu0 }
 0x10a   : > { %v516_v6 = vadd.f32 %v1143_v4, %v1488_v60  ;;  %1184 = vmatprep.mubr.bf16.mxu1 %v591_v2  ;;  %v571_v12 = vmax.f32 %v505_v5, 0.0 }
 0x10b   : > { %v507_v8 = vpop.f32.mrf.mxu0  ;;  %1185 = vmatmul.mubr.bf16.gmra.mxu1 %v592_v3 }
 0x10c   : > { %v508_v9 = vadd.f32 %v1488_v60, %v507_v8  ;;  %v574_v10 = vmax.f32 %v516_v6, 0.0 }
 0x10d   : > { %v1146_v11 = vpop.f32.mrf.mxu0 }
 0x10e   : > { %v572_v13 = vmax.f32 %v508_v9, 0.0  ;;  %v594_v17 = vpack.c.bf16 %v574_v10, %v573_v14  ;;  %v529_v21 = vadd.f32 %v1146_v11, %v1488_v60 }
 0x10f   : > { %v520_v15 = vpop.f32.mrf.mxu0 }
 0x110   : > { %v593_v16 = vpack.c.bf16 %v572_v13, %v571_v12  ;;  %v521_v19 = vadd.f32 %v1488_v60, %v520_v15  ;;  %v577_v28 = vmax.f32 %v529_v21, 0.0 }
 0x111   : > { %v1147_v18 = vpop.f32.mrf.mxu0 }
 0x112   : > { %v532_v20 = vadd.f32 %v1147_v18, %v1488_v60  ;;  %1188 = vmatprep.mubr.bf16.mxu1 %v593_v16  ;;  %v575_v26 = vmax.f32 %v521_v19, 0.0 }
 0x113   : > { %v523_v22 = vpop.f32.mrf.mxu0  ;;  %1189 = vmatmul.mubr.bf16.gmra.mxu1 %v594_v17 }
 0x114   : > { %v524_v23 = vadd.f32 %v1488_v60, %v523_v22  ;;  %v578_v24 = vmax.f32 %v532_v20, 0.0 }
 0x115   : > { %v1150_v25 = vpop.f32.mrf.mxu0 }
 0x116   : > { %v576_v27 = vmax.f32 %v524_v23, 0.0  ;;  %v596_v31 = vpack.c.bf16 %v578_v24, %v577_v28  ;;  %v545_v35 = vadd.f32 %v1150_v25, %v1488_v60 }
 0x117   : > { %v536_v29 = vpop.f32.mrf.mxu0 }
 0x118   : > { %v595_v30 = vpack.c.bf16 %v576_v27, %v575_v26  ;;  %v537_v33 = vadd.f32 %v1488_v60, %v536_v29  ;;  %v581_v41 = vmax.f32 %v545_v35, 0.0 }
 0x119   : > { %v1151_v32 = vpop.f32.mrf.mxu0 }
 0x11a   : > { %v548_v34 = vadd.f32 %v1151_v32, %v1488_v60  ;;  %1192 = vmatprep.mubr.bf16.mxu1 %v595_v30  ;;  %v579_v39 = vmax.f32 %v537_v33, 0.0 }
 0x11b   : > { %v539_v36 = vpop.f32.mrf.mxu0  ;;  %1193 = vmatmul.mubr.bf16.gmra.mxu1 %v596_v31 }
 0x11c   : > { %v540_v37 = vadd.f32 %v1488_v60, %v539_v36  ;;  %v582_v38 = vmax.f32 %v548_v34, 0.0  ;;  %v1531_v60 = vld [vmem:[%s1634_s4] ss:$0 sm:$0xff] }
 0x11e   : > { %v580_v40 = vmax.f32 %v540_v37, 0.0  ;;  %v598_v43 = vpack.c.bf16 %v582_v38, %v581_v41 }
 0x120   : > { %v597_v42 = vpack.c.bf16 %v580_v40, %v579_v39 }
 0x122   : > { %1196 = vmatprep.mubr.bf16.mxu1 %v597_v42 }
 0x123   : > { %1197 = vmatmul.mubr.bf16.gmra.mxu1 %v598_v43 }
 0x1ab   : > { %v1170_v45 = vpop.f32.mrf.mxu1 }
 0x1ac   : > { %v713_v47 = vadd.f32 %v1170_v45, %v1531_v60 }
 0x1ad   : > { %v704_v46 = vpop.f32.mrf.mxu1 }
 0x1ae   : > { %v705_v49 = vadd.f32 %v1531_v60, %v704_v46  ;;  %v833_v52 = vmax.f32 %v713_v47, 0.0 }
 0x1af   : > { %v1171_v48 = vpop.f32.mrf.mxu1 }
 0x1b0   : > { %v716_v50 = vadd.f32 %v1171_v48, %v1531_v60  ;;  %v831_v56 = vmax.f32 %v705_v49, 0.0 }
 0x1b1   : > { %v707_v51 = vpop.f32.mrf.mxu1 }
 0x1b2   : > { %v834_v53 = vmax.f32 %v716_v50, 0.0  ;;  %v708_v54 = vadd.f32 %v1531_v60, %v707_v51 }
 0x1b3   : > { %v1174_v55 = vpop.f32.mrf.mxu1 }
 0x1b4   : > { %v1537_v57 = vpack.c.bf16 %v834_v53, %v833_v52  ;;  %v832_v58 = vmax.f32 %v708_v54, 0.0  ;;  %v729_v62 = vadd.f32 %v1174_v55, %v1531_v60 }
 0x1b5   : > { %v720_v59 = vpop.f32.mrf.mxu1 }
 0x1b6   : > { %v1539_v61 = vpack.c.bf16 %v832_v58, %v831_v56  ;;  %v721_v0 = vadd.f32 %v1531_v60, %v720_v59  ;;  %v837_v3 = vmax.f32 %v729_v62, 0.0 }
 0x1b7   : > { %v1175_v63 = vpop.f32.mrf.mxu1 }
 0x1b8   : > { %v732_v1 = vadd.f32 %v1175_v63, %v1531_v60  ;;  %v835_v7 = vmax.f32 %v721_v0, 0.0 }
 0x1b9   : > { %v723_v2 = vpop.f32.mrf.mxu1 }
 0x1ba   : > { %v838_v4 = vmax.f32 %v732_v1, 0.0  ;;  %v724_v5 = vadd.f32 %v1531_v60, %v723_v2 }
 0x1bb   : > { %v1545_v6 = vpop.f32.mrf.mxu1 }
 0x1bc   : > { %v1547_v8 = vpack.c.bf16 %v838_v4, %v837_v3  ;;  %v836_v9 = vmax.f32 %v724_v5, 0.0 }
 0x1bd   : > { %v1549_v10 = vpop.f32.mrf.mxu1 }
 0x1be   : > { %v1551_v11 = vpack.c.bf16 %v836_v9, %v835_v7 }
 0x1bf   : > { %v1179_v12 = vpop.f32.mrf.mxu1 }
 0x1c0   : > { %v748_v9 = vadd.f32 %v1179_v12, %v1531_v60 }
 0x1c1   : > { %v1553_v13 = vpop.f32.mrf.mxu1 }
 0x1c3   : > { %v1182_v14 = vpop.f32.mrf.mxu1 }
 0x1c4   : > { %v761_v45 = vadd.f32 %v1182_v14, %v1531_v60 }
 0x1c5   : > { %v752_v15 = vpop.f32.mrf.mxu1 }
 0x1c6   : > { %v845_v54 = vmax.f32 %v761_v45, 0.0  ;;  %v753_v1 = vadd.f32 %v1531_v60, %v752_v15 }
 0x1c7   : > { %v1183_v16 = vpop.f32.mrf.mxu1 }
 0x1c8   : > { %v764_v41 = vadd.f32 %v1183_v16, %v1531_v60  ;;  %v843_v5 = vmax.f32 %v753_v1, 0.0 }
 0x1c9   : > { %v755_v17 = vpop.f32.mrf.mxu1 }
 0x1ca   : > { %v846_v49 = vmax.f32 %v764_v41, 0.0  ;;  %v756_v62 = vadd.f32 %v1531_v60, %v755_v17  ;;  %v881_v41 = vstv %s880_s10 }
 0x1cb   : > { %v1186_v18 = vpop.f32.mrf.mxu1 }
 0x1cc   : > { %v777_v20 = vadd.f32 %v1186_v18, %v1531_v60  ;;  %v871_v59 = vpack.c.bf16 %v846_v49, %v845_v54  ;;  %v844_v3 = vmax.f32 %v756_v62, 0.0  ;;  %v745_v18 = vadd.f32 %v1545_v6, %v1531_v60 }
 0x1cd   : > { %v768_v19 = vpop.f32.mrf.mxu1 }
 0x1ce   : > { %v769_v22 = vadd.f32 %v1531_v60, %v768_v19  ;;  %v849_v25 = vmax.f32 %v777_v20, 0.0  ;;  %v870_v14 = vpack.c.bf16 %v844_v3, %v843_v5  ;;  %v842_v19 = vmax.f32 %v748_v9, 0.0 }
 0x1cf   : > { %v1187_v21 = vpop.f32.mrf.mxu1 }
 0x1d0   : > { %v780_v23 = vadd.f32 %v1187_v21, %v1531_v60  ;;  %v847_v29 = vmax.f32 %v769_v22, 0.0  ;;  %v841_v21 = vmax.f32 %v745_v18, 0.0 }
 0x1d1   : > { %v771_v24 = vpop.f32.mrf.mxu1 }
 0x1d2   : > { %v850_v26 = vmax.f32 %v780_v23, 0.0  ;;  %v772_v27 = vadd.f32 %v1531_v60, %v771_v24  ;;  %v869_v23 = vpack.c.bf16 %v842_v19, %v841_v21  ;;  %v740_v24 = vadd.f32 %v1531_v60, %v1553_v13 }
 0x1d3   : > { %v1190_v28 = vpop.f32.mrf.mxu1 }
 0x1d4   : > { %v1559_v30 = vpack.c.bf16 %v850_v26, %v849_v25  ;;  %v848_v31 = vmax.f32 %v772_v27, 0.0  ;;  %v737_v26 = vadd.f32 %v1531_v60, %v1549_v10  ;;  %v793_v6 = vadd.f32 %v1190_v28, %v1531_v60 }
 0x1d5   : > { %v1561_v32 = vpop.f32.mrf.mxu1  ;;  %v840_v27 = vmax.f32 %v740_v24, 0.0 }
 0x1d6   : > { %v1563_v33 = vpack.c.bf16 %v848_v31, %v847_v29  ;;  %v839_v31 = vmax.f32 %v737_v26, 0.0  ;;  %v785_v13 = vadd.f32 %v1531_v60, %v1561_v32  ;;  %v929_v32 = vlaneseq }
 0x1d7   : > { %v1191_v34 = vpop.f32.mrf.mxu1 }
 0x1d8   : > { %v796_v12 = vadd.f32 %v1191_v34, %v1531_v60  ;;  %v851_v10 = vmax.f32 %v785_v13, 0.0  ;;  %vm943_vm2 = vcmp.lt.s32.totalorder %v929_v32, 256 }
 0x1d9   : > { %v787_v35 = vpop.f32.mrf.mxu1 }
 0x1da   : > { %v854_v29 = vmax.f32 %v796_v12, 0.0 }
 0x1db   : > { %v1194_v36 = vpop.f32.mrf.mxu1 }
 0x1dc   : > { %v809_v2 = vadd.f32 %v1194_v36, %v1531_v60  ;;  %v853_v36 = vmax.f32 %v793_v6, 0.0 }
 0x1dd   : > { %v800_v37 = vpop.f32.mrf.mxu1 }
 0x1de   : > { %v857_v7 = vmax.f32 %v809_v2, 0.0  ;;  %v801_v15 = vadd.f32 %v1531_v60, %v800_v37  ;;  %v868_v37 = vpack.c.bf16 %v840_v27, %v839_v31 }
 0x1df   : > { %v1195_v38 = vpop.f32.mrf.mxu1 }
 0x1e0   : > { %v812_v63 = vadd.f32 %v1195_v38, %v1531_v60  ;;  %v855_v22 = vmax.f32 %v801_v15, 0.0  ;;  %v875_v38 = vpack.c.bf16 %v854_v29, %v853_v36 }
 0x1e1   : > { %v803_v39 = vpop.f32.mrf.mxu1 }
 0x1e2   : > { %v858_v4 = vmax.f32 %v812_v63, 0.0  ;;  %v804_v17 = vadd.f32 %v1531_v60, %v803_v39  ;;  %v788_v39 = vadd.f32 %v1531_v60, %v787_v35 }
 0x1e3   : > { %v1198_v40 = vpop.f32.mrf.mxu1 }
 0x1e4   : > { %v825_v43 = vadd.f32 %v1198_v40, %v1531_v60  ;;  %v877_v16 = vpack.c.bf16 %v858_v4, %v857_v7  ;;  %v856_v20 = vmax.f32 %v804_v17, 0.0  ;;  %v852_v34 = vmax.f32 %v788_v39, 0.0 }
 0x1e5   : > { %v816_v42 = vpop.f32.mrf.mxu1 }
 0x1e6   : > { %v817_v47 = vadd.f32 %v1531_v60, %v816_v42  ;;  %v861_v51 = vmax.f32 %v825_v43, 0.0  ;;  %v876_v25 = vpack.c.bf16 %v856_v20, %v855_v22  ;;  %v874_v40 = vpack.c.bf16 %v852_v34, %v851_v10 }
 0x1e7   : > { %v1199_v46 = vpop.f32.mrf.mxu1 }
 0x1e8   : > { %v828_v48 = vadd.f32 %v1199_v46, %v1531_v60  ;;  %v859_v55 = vmax.f32 %v817_v47, 0.0 }
 0x1e9   : > { %v819_v50 = vpop.f32.mrf.mxu1 }
 0x1ea   : > { %v862_v52 = vmax.f32 %v828_v48, 0.0  ;;  %v820_v53 = vadd.f32 %v1531_v60, %v819_v50  ;;  %v1311_v60 = vmov 1966171168  }
 0x1eb   : > { %v927_v28 = vunpack.c.l.s4 %v1311_v60 }
 0x1ec   : > { %v879_v56 = vpack.c.bf16 %v862_v52, %v861_v51  ;;  %v860_v58 = vmax.f32 %v820_v53, 0.0 }
 0x1ed   : > { %v928_v35 = vunpack.c.0.s8 %v927_v28 }
 0x1ee   : > { %v878_v0 = vpack.c.bf16 %v860_v58, %v859_v55  ;;  %1100 = vmatprep.subr.bf16.mxu0 %v879_v56 }
 0x1ef   : > { %1101 = vmatpush3.bf16.xpose.msra.mxu0 %v871_v59 }
 0x1f0   : > { %1102 = vmatprep.subr.bf16.mxu0 %v878_v0 }
 0x1f7   : > { %1103 = vmatpush3.bf16.xpose.msra.mxu0 %v870_v14 }
 0x1f8   : > { %1104 = vmatprep.subr.bf16.mxu0 %v877_v16 }
 0x1ff   : > { %1105 = vmatpush3.bf16.xpose.msra.mxu0 %v869_v23 }
 0x200   : > { %1106 = vmatprep.subr.bf16.mxu0 %v876_v25 }
 0x207   : > { %1107 = vmatpush3.bf16.xpose.msra.mxu0 %v868_v37 }
 0x208   : > { %1108 = vmatprep.subr.bf16.mxu0 %v875_v38 }
 0x20f   : > { %1109 = vmatpush3.bf16.xpose.msra.mxu0 %v1547_v8  ;;  %v930_v8 = vshrl.u32 %v929_v32, 7 }
 0x210   : > { %1110 = vmatprep.subr.bf16.mxu0 %v874_v40 }
 0x217   : > { %1111 = vmatpush3.bf16.xpose.msra.mxu0 %v1551_v11 }
 0x218   : > { %1112 = vmatprep.subr.bf16.mxu0 %v1559_v30 }
 0x21f   : > { %1113 = vmatpush3.bf16.xpose.msra.mxu0 %v1537_v57 }
 0x220   : > { %1114 = vmatprep.subr.bf16.mxu0 %v1563_v33  ;;  %v931_v33 = vsub.s32 %v928_v35, %v930_v8 }
 0x227   : > { %1115 = vmatpush3.bf16.xpose.msra.mxu0 %v1539_v61 }
 0x22e   : > { %1117 = vmatmul.mubr.bf16.vlgmr.msra.gmra.mxu0 %v1525_v44 }
 0x2ee   : > { %v916_v11 = vpop.f32.mrf.mxu0 }
 0x2ef   : > { %v917_v42 = vadd.f32 %v916_v11, %v881_v41 }
 0x2f0   : > { %v918_v30 = vpop.f32.mrf.mxu0 }
 0x2f1   : > { %v919_v57 = vadd.f32 %v918_v30, %v881_v41 }
 0x2f2   : > { %v920_v43 = vpop.f32.mrf.mxu0 }
 0x2f3   : > { %v925_v61 = vcombine.low %v917_v42, %v919_v57 }
 0x2f4   : > { %v921_v45 = vpop.f32.mrf.mxu0 }
 0x2f5   : > { %v932_v44 = vrot.slane %v925_v61, %v931_v33 }
 0x2f7   : > { %v939_v46 = vrot.slane %v932_v44, %v931_v33 }
 0x2f9   : > { %945 = vst.msk [vmem:[%s273_s17] sm:$0x3] %vm943_vm2, %v939_v46 }
 0x2fa   : > { %1262 = shalt.err (!%p1259_p3)
}
 0x2fb   : > { %s1263_s30 = scalar_lea.hbm %s959_s21, 32  ;;  %s1267_s10 = scalar_lea.hbm %s1637_s7, 96 }
 0x2fc   : > { %p1264_p4 = scmp.ne.s32.totalorder %s959_s21, %s1263_s30  ;;  %p1268_p9 = scmp.lt.s32.totalorder %s959_s21, %s1637_s7 }
 0x2fd   : > { %p1269_p10 = scmp.lt.s32.totalorder %s1267_s10, %s1263_s30 }
 0x2fe   : > { %p1265_p7 = pnand %p1264_p4, %p1391_p5 }
 0x2ff   : > { %p1270_p11 = por %p1269_p10, %p1268_p9 }
 0x300   : > { %p1266_p8 = pneg %p1265_p7 }
 0x302   : > { %p1271_p12 = pnand %p1270_p11, %p1266_p8 }
 0x304   : > { %1274 = shalt.err (!%p1271_p12)
}
 0x305   : > { %1201 = dma.vmem_to_hbm [thread:$0]  (%p1391_p5), %s962_s18, 32, %s959_s21, %s947_s22  }
 0x306 PF: > { %p1207_p13 = scmp.ge.s32.totalorder %s1309_s29, 2  ;;  %s973_s17 = sand.u32 1, %s1297_s26  }
 0x307   : > { %s974_s19 = scalar_lea.sflag [#allocation4], %s973_s17 }
 0x308   : > { %p1204_p0 = pnand %p1207_p13, %p1395_p6 }
 0x30a   : > { %p1205_p1 = pneg %p1204_p0 }
 0x30c   : > { %1292 = dma.done.wait (%p1205_p1), %s974_s19, 32  }
 0x30d   : > { %1294 = vsyncadd (%p1205_p1), %s974_s19, 4294967264  ;;  %p18_p2 = scmp.ge.s32.totalorder %s1379_s8, 5   ;;  %s1640_s26 = smov %s1301_s27 }
 0x30e   : > { %s1641_s27 = smov %s1305_s28  ;;  %s1642_s28 = smov %s1389_s11 }
 0x30f   : > { %s1643_s29 = smov %s1379_s8  ;;  %20 = sbr.rel (!%p18_p2) target bundleno = 5 (0x5), region = 83 }
 0x314   :  { %979 = vsyncpa [#allocation4], 1 }
 0x315   :  { %981 = vsyncpa [#allocation4 + $0x1], 1 }

</bundles_post_ra>
